<compile_context>
chip_gen: v7x
topology: tpu7x:2x2x1
jax: 0.10.0
libtpu: 0.0.40
codegen_flags: <defaults>
</compile_context>

<pallas_src>
import jax
import jax.numpy as jnp
from jax import lax
from jax.experimental import pallas as pl
from jax.experimental.pallas import tpu as pltpu


def _dwconv_kernel(x_ref, top_ref, bot_ref, w_ref, b_ref, o_ref):
    # x_ref  : (1, TH, W, C)   main rows of this H tile
    # top_ref: (1, 1,  W, C)   row just above the tile (clamped at the border)
    # bot_ref: (1, 1,  W, C)   row just below the tile (clamped at the border)
    # w_ref  : (3, 3, C)       depthwise kernel, HWC
    # b_ref  : (1, C)          bias
    # o_ref  : (1, TH, W, C)
    _, TH, W, C = o_ref.shape
    dt = x_ref.dtype
    hi = pl.program_id(2)
    nh = pl.num_programs(2)

    # Halo rows: the clamped index_map fetched a valid-but-wrong row at the
    # image border; zero it there (== conv zero padding of 1).
    top_scale = jnp.where(hi > 0, 1.0, 0.0).astype(dt)
    bot_scale = jnp.where(hi < nh - 1, 1.0, 0.0).astype(dt)
    top = (top_ref[0, 0] * top_scale)[None]          # (1, W, C)
    bot = (bot_ref[0, 0] * bot_scale)[None]          # (1, W, C)

    # (TH + 2, W, C) slab in the input dtype (H is an outer dim -> cheap concat).
    xt = jnp.concatenate([top, x_ref[0], bot], axis=0)

    # W-neighbour taps with zero padding at w = 0 / w = W - 1.
    # (pltpu.roll on the sublane axis + mask is an XLU-slot alternative here.)
    if W > 1:
        zcol = jnp.zeros((TH + 2, 1, C), dt)
        x_left = jnp.concatenate([zcol, xt[:, :W - 1, :]], axis=1)   # x[h, w-1]
        x_right = jnp.concatenate([xt[:, 1:, :], zcol], axis=1)      # x[h, w+1]
    else:
        x_left = jnp.zeros_like(xt)
        x_right = jnp.zeros_like(xt)

    w = w_ref[...]                                   # (3, 3, C), input dtype

    # f32 accumulator seeded with the bias broadcast (skips a final add pass).
    acc = jnp.broadcast_to(b_ref[0].astype(jnp.float32), (TH, W, C))
    for dh in range(3):
        rows = slice(dh, dh + TH)
        acc = acc + x_left[rows] * w[dh, 0]          # tap (dh-1, -1)
        acc = acc + xt[rows] * w[dh, 1]              # tap (dh-1,  0)
        acc = acc + x_right[rows] * w[dh, 2]         # tap (dh-1, +1)

    o_ref[0] = acc.astype(o_ref.dtype)


def _pick_tile_c(C):
    """Channel tile: a multiple of 128 when C allows (lane-dense stores)."""
    if C % 128 == 0:
        for tc in (512, 384, 256, 128):
            if C % tc == 0:
                return tc
    return C


def _pick_tile_h(H, W, tc, itemsize, budget_bytes=20 * 1024 * 1024):
    """Largest divisor of H whose tile fits a conservative VMEM budget.

    Per output row a tile holds roughly: double-buffered input + output blocks
    (2 + 2 copies in the input dtype), the xt/x_left/x_right value slabs
    (3 copies in the input dtype) and the f32 accumulator.
    """
    per_row = W * tc * (7 * itemsize + 4)
    th_cap = max(1, budget_bytes // max(per_row, 1))
    th = 1
    for cand in range(1, H + 1):
        if H % cand == 0 and cand <= th_cap:
            th = cand
    return th


def dwconv(x, H, W, weight, bias):
    """DWConv.forward: x (B, N, C) -> (B, N, C); depthwise 3x3, stride 1, pad 1.

    weight: (C, 1, 3, 3)   (PyTorch nn.Conv2d(dim, dim, 3, groups=dim) layout)
    bias  : (C,)
    """
    B, N, C = x.shape
    assert N == H * W
    x_nhwc = x.reshape(B, H, W, C)                                    # free reshape
    w_hwc = jnp.transpose(weight[:, 0, :, :], (1, 2, 0)).astype(x.dtype)  # (3,3,C)
    b2 = bias.reshape(1, C)

    tc = _pick_tile_c(C)
    th = _pick_tile_h(H, W, tc, x.dtype.itemsize)
    n_c = C // tc
    n_h = H // th

    out = pl.pallas_call(
        _dwconv_kernel,
        out_shape=jax.ShapeDtypeStruct((B, H, W, C), x.dtype),
        grid_spec=pltpu.PrefetchScalarGridSpec(
            num_scalar_prefetch=0,
            grid=(B, n_c, n_h),
            in_specs=[
                # main rows of the H tile
                pl.BlockSpec((1, th, W, tc), lambda b, c, h: (b, h, 0, c)),
                # 1-row top halo (row index clamped at the image border)
                pl.BlockSpec((1, 1, W, tc),
                             lambda b, c, h: (b, jnp.maximum(h * th - 1, 0), 0, c)),
                # 1-row bottom halo (clamped)
                pl.BlockSpec((1, 1, W, tc),
                             lambda b, c, h: (b, jnp.minimum(h * th + th, H - 1), 0, c)),
                pl.BlockSpec((3, 3, tc), lambda b, c, h: (0, 0, c)),
                pl.BlockSpec((1, tc), lambda b, c, h: (0, c)),
            ],
            out_specs=pl.BlockSpec((1, th, W, tc), lambda b, c, h: (b, h, 0, c)),
        ),
        compiler_params=pltpu.CompilerParams(
            dimension_semantics=("parallel", "parallel", "parallel"),
            vmem_limit_bytes=48 * 1024 * 1024,
        ),
    )(x_nhwc, x_nhwc, x_nhwc, w_hwc, b2)

    return out.reshape(B, N, C)


def _reference(x, H, W, weight, bias):
    # Pure-JAX reference using lax.conv with feature_group_count = C.
    B, N, C = x.shape
    x_nchw = jnp.transpose(x, (0, 2, 1)).reshape(B, C, H, W)
    y = lax.conv_general_dilated(
        x_nchw.astype(jnp.float32),
        weight.astype(jnp.float32),          # (C, 1, 3, 3) == (O, I/g, kH, kW)
        window_strides=(1, 1),
        padding=((1, 1), (1, 1)),
        dimension_numbers=("NCHW", "OIHW", "NCHW"),
        feature_group_count=C,
    ) + bias.astype(jnp.float32)[None, :, None, None]
    return jnp.transpose(y.reshape(B, C, H * W), (0, 2, 1)).astype(x.dtype)


if __name__ == "__main__":
    B, C, H, W = 2, 4, 16, 16
    N = H * W

    key = jax.random.PRNGKey(0)
    kx, kw, kb = jax.random.split(key, 3)
    x = jax.random.normal(kx, (B, N, C), dtype=jnp.float32)
    # Deterministic synthetic parameters (nn.Conv2d(dim, dim, 3, groups=dim)).
    weight = jax.random.normal(kw, (C, 1, 3, 3), dtype=jnp.float32) * 0.1
    bias = jax.random.normal(kb, (C,), dtype=jnp.float32) * 0.1

    out = dwconv(x, H, W, weight, bias)
    out = jax.block_until_ready(out)

    ref = _reference(x, H, W, weight, bias)
    assert out.shape == (B, N, C)
    assert jnp.allclose(out, ref, atol=1e-4, rtol=1e-4), "mismatch vs reference"

    print("KERNEL_OK")
</pallas_src>

<mosaic_0001>
module attributes {stable_mosaic.version = 11 : i64} {
  func.func @_dwconv_kernel(%arg0: i32, %arg1: i32, %arg2: i32, %arg3: memref<1x16x16x4xf32, #tpu.memory_space<vmem>>, %arg4: memref<1x1x16x4xf32, #tpu.memory_space<vmem>>, %arg5: memref<1x1x16x4xf32, #tpu.memory_space<vmem>>, %arg6: memref<3x3x4xf32, #tpu.memory_space<vmem>>, %arg7: memref<1x4xf32, #tpu.memory_space<vmem>>, %arg8: memref<1x16x16x4xf32, #tpu.memory_space<vmem>>) attributes {dimension_semantics = [#tpu.dimension_semantics<parallel>, #tpu.dimension_semantics<parallel>, #tpu.dimension_semantics<parallel>], iteration_bounds = array<i64: 2, 1, 1>, scalar_prefetch = 0 : i64, scratch_operands = 0 : i64, tpu.core_type = #tpu.core_type<tc>, window_params = [{transform_indices = @transform_0, window_bounds = array<i64: 1, 16, 16, 4>}, {transform_indices = @transform_1, window_bounds = array<i64: 1, 1, 16, 4>}, {transform_indices = @transform_2, window_bounds = array<i64: 1, 1, 16, 4>}, {transform_indices = @transform_3, window_bounds = array<i64: 3, 3, 4>}, {transform_indices = @transform_4, window_bounds = array<i64: 1, 4>}, {transform_indices = @transform_5, window_bounds = array<i64: 1, 16, 16, 4>}]} {
    %c0_i32 = arith.constant 0 : i32
    %0 = arith.cmpi sgt, %arg2, %c0_i32 : i32
    %cst = arith.constant 1.000000e+00 : f32
    %cst_0 = arith.constant 0.000000e+00 : f32
    %1 = arith.select %0, %cst, %cst_0 : f32
    %c0_i32_1 = arith.constant 0 : i32
    %2 = arith.cmpi slt, %arg2, %c0_i32_1 : i32
    %cst_2 = arith.constant 1.000000e+00 : f32
    %cst_3 = arith.constant 0.000000e+00 : f32
    %3 = arith.select %2, %cst_2, %cst_3 : f32
    %c0 = arith.constant 0 : index
    %c0_4 = arith.constant 0 : index
    %c0_5 = arith.constant 0 : index
    %c0_6 = arith.constant 0 : index
    %4 = vector.load %arg4[%c0, %c0_4, %c0_5, %c0_6] : memref<1x1x16x4xf32, #tpu.memory_space<vmem>>, vector<1x1x16x4xf32>
    %5 = vector.shape_cast %4 : vector<1x1x16x4xf32> to vector<16x4xf32>
    %6 = vector.broadcast %1 : f32 to vector<16x4xf32>
    %7 = arith.mulf %5, %6 : vector<16x4xf32>
    %8 = vector.shape_cast %7 : vector<16x4xf32> to vector<1x16x4xf32>
    %c0_7 = arith.constant 0 : index
    %c0_8 = arith.constant 0 : index
    %c0_9 = arith.constant 0 : index
    %c0_10 = arith.constant 0 : index
    %9 = vector.load %arg5[%c0_7, %c0_8, %c0_9, %c0_10] : memref<1x1x16x4xf32, #tpu.memory_space<vmem>>, vector<1x1x16x4xf32>
    %10 = vector.shape_cast %9 : vector<1x1x16x4xf32> to vector<16x4xf32>
    %11 = vector.broadcast %3 : f32 to vector<16x4xf32>
    %12 = arith.mulf %10, %11 : vector<16x4xf32>
    %13 = vector.shape_cast %12 : vector<16x4xf32> to vector<1x16x4xf32>
    %c0_11 = arith.constant 0 : index
    %c0_12 = arith.constant 0 : index
    %c0_13 = arith.constant 0 : index
    %c0_14 = arith.constant 0 : index
    %14 = vector.load %arg3[%c0_11, %c0_12, %c0_13, %c0_14] : memref<1x16x16x4xf32, #tpu.memory_space<vmem>>, vector<1x16x16x4xf32>
    %15 = vector.shape_cast %14 : vector<1x16x16x4xf32> to vector<16x16x4xf32>
    %16 = tpu.concatenate %8, %15, %13 in 0 : vector<1x16x4xf32>, vector<16x16x4xf32>, vector<1x16x4xf32> -> vector<18x16x4xf32>
    %cst_15 = arith.constant 0.000000e+00 : f32
    %17 = vector.broadcast %cst_15 : f32 to vector<18x1x4xf32>
    %18 = vector.extract_strided_slice %16 {offsets = [0, 0, 0], sizes = [18, 15, 4], strides = [1, 1, 1]} : vector<18x16x4xf32> to vector<18x15x4xf32>
    %19 = tpu.concatenate %17, %18 in 1 : vector<18x1x4xf32>, vector<18x15x4xf32> -> vector<18x16x4xf32>
    %20 = vector.extract_strided_slice %16 {offsets = [0, 1, 0], sizes = [18, 15, 4], strides = [1, 1, 1]} : vector<18x16x4xf32> to vector<18x15x4xf32>
    %21 = tpu.concatenate %20, %17 in 1 : vector<18x15x4xf32>, vector<18x1x4xf32> -> vector<18x16x4xf32>
    %c0_16 = arith.constant 0 : index
    %c0_17 = arith.constant 0 : index
    %c0_18 = arith.constant 0 : index
    %22 = vector.load %arg6[%c0_16, %c0_17, %c0_18] : memref<3x3x4xf32, #tpu.memory_space<vmem>>, vector<3x3x4xf32>
    %c0_19 = arith.constant 0 : index
    %c0_20 = arith.constant 0 : index
    %23 = vector.load %arg7[%c0_19, %c0_20] : memref<1x4xf32, #tpu.memory_space<vmem>>, vector<1x4xf32>
    %24 = vector.shape_cast %23 : vector<1x4xf32> to vector<4xf32>
    %25 = vector.shape_cast %24 : vector<4xf32> to vector<1x1x4xf32>
    %26 = vector.broadcast %25 : vector<1x1x4xf32> to vector<16x16x4xf32>
    %27 = vector.extract_strided_slice %19 {offsets = [0, 0, 0], sizes = [16, 16, 4], strides = [1, 1, 1]} : vector<18x16x4xf32> to vector<16x16x4xf32>
    %28 = vector.extract_strided_slice %22 {offsets = [0, 0, 0], sizes = [1, 1, 4], strides = [1, 1, 1]} : vector<3x3x4xf32> to vector<1x1x4xf32>
    %29 = vector.shape_cast %28 : vector<1x1x4xf32> to vector<4xf32>
    %30 = vector.shape_cast %29 : vector<4xf32> to vector<1x1x4xf32>
    %31 = vector.broadcast %30 : vector<1x1x4xf32> to vector<16x16x4xf32>
    %32 = arith.mulf %27, %31 : vector<16x16x4xf32>
    %33 = arith.addf %26, %32 : vector<16x16x4xf32>
    %34 = vector.extract_strided_slice %16 {offsets = [0, 0, 0], sizes = [16, 16, 4], strides = [1, 1, 1]} : vector<18x16x4xf32> to vector<16x16x4xf32>
    %35 = vector.extract_strided_slice %22 {offsets = [0, 1, 0], sizes = [1, 1, 4], strides = [1, 1, 1]} : vector<3x3x4xf32> to vector<1x1x4xf32>
    %36 = vector.shape_cast %35 : vector<1x1x4xf32> to vector<4xf32>
    %37 = vector.shape_cast %36 : vector<4xf32> to vector<1x1x4xf32>
    %38 = vector.broadcast %37 : vector<1x1x4xf32> to vector<16x16x4xf32>
    %39 = arith.mulf %34, %38 : vector<16x16x4xf32>
    %40 = arith.addf %33, %39 : vector<16x16x4xf32>
    %41 = vector.extract_strided_slice %21 {offsets = [0, 0, 0], sizes = [16, 16, 4], strides = [1, 1, 1]} : vector<18x16x4xf32> to vector<16x16x4xf32>
    %42 = vector.extract_strided_slice %22 {offsets = [0, 2, 0], sizes = [1, 1, 4], strides = [1, 1, 1]} : vector<3x3x4xf32> to vector<1x1x4xf32>
    %43 = vector.shape_cast %42 : vector<1x1x4xf32> to vector<4xf32>
    %44 = vector.shape_cast %43 : vector<4xf32> to vector<1x1x4xf32>
    %45 = vector.broadcast %44 : vector<1x1x4xf32> to vector<16x16x4xf32>
    %46 = arith.mulf %41, %45 : vector<16x16x4xf32>
    %47 = arith.addf %40, %46 : vector<16x16x4xf32>
    %48 = vector.extract_strided_slice %19 {offsets = [1, 0, 0], sizes = [16, 16, 4], strides = [1, 1, 1]} : vector<18x16x4xf32> to vector<16x16x4xf32>
    %49 = vector.extract_strided_slice %22 {offsets = [1, 0, 0], sizes = [1, 1, 4], strides = [1, 1, 1]} : vector<3x3x4xf32> to vector<1x1x4xf32>
    %50 = vector.shape_cast %49 : vector<1x1x4xf32> to vector<4xf32>
    %51 = vector.shape_cast %50 : vector<4xf32> to vector<1x1x4xf32>
    %52 = vector.broadcast %51 : vector<1x1x4xf32> to vector<16x16x4xf32>
    %53 = arith.mulf %48, %52 : vector<16x16x4xf32>
    %54 = arith.addf %47, %53 : vector<16x16x4xf32>
    %55 = vector.extract_strided_slice %16 {offsets = [1, 0, 0], sizes = [16, 16, 4], strides = [1, 1, 1]} : vector<18x16x4xf32> to vector<16x16x4xf32>
    %56 = vector.extract_strided_slice %22 {offsets = [1, 1, 0], sizes = [1, 1, 4], strides = [1, 1, 1]} : vector<3x3x4xf32> to vector<1x1x4xf32>
    %57 = vector.shape_cast %56 : vector<1x1x4xf32> to vector<4xf32>
    %58 = vector.shape_cast %57 : vector<4xf32> to vector<1x1x4xf32>
    %59 = vector.broadcast %58 : vector<1x1x4xf32> to vector<16x16x4xf32>
    %60 = arith.mulf %55, %59 : vector<16x16x4xf32>
    %61 = arith.addf %54, %60 : vector<16x16x4xf32>
    %62 = vector.extract_strided_slice %21 {offsets = [1, 0, 0], sizes = [16, 16, 4], strides = [1, 1, 1]} : vector<18x16x4xf32> to vector<16x16x4xf32>
    %63 = vector.extract_strided_slice %22 {offsets = [1, 2, 0], sizes = [1, 1, 4], strides = [1, 1, 1]} : vector<3x3x4xf32> to vector<1x1x4xf32>
    %64 = vector.shape_cast %63 : vector<1x1x4xf32> to vector<4xf32>
    %65 = vector.shape_cast %64 : vector<4xf32> to vector<1x1x4xf32>
    %66 = vector.broadcast %65 : vector<1x1x4xf32> to vector<16x16x4xf32>
    %67 = arith.mulf %62, %66 : vector<16x16x4xf32>
    %68 = arith.addf %61, %67 : vector<16x16x4xf32>
    %69 = vector.extract_strided_slice %19 {offsets = [2, 0, 0], sizes = [16, 16, 4], strides = [1, 1, 1]} : vector<18x16x4xf32> to vector<16x16x4xf32>
    %70 = vector.extract_strided_slice %22 {offsets = [2, 0, 0], sizes = [1, 1, 4], strides = [1, 1, 1]} : vector<3x3x4xf32> to vector<1x1x4xf32>
    %71 = vector.shape_cast %70 : vector<1x1x4xf32> to vector<4xf32>
    %72 = vector.shape_cast %71 : vector<4xf32> to vector<1x1x4xf32>
    %73 = vector.broadcast %72 : vector<1x1x4xf32> to vector<16x16x4xf32>
    %74 = arith.mulf %69, %73 : vector<16x16x4xf32>
    %75 = arith.addf %68, %74 : vector<16x16x4xf32>
    %76 = vector.extract_strided_slice %16 {offsets = [2, 0, 0], sizes = [16, 16, 4], strides = [1, 1, 1]} : vector<18x16x4xf32> to vector<16x16x4xf32>
    %77 = vector.extract_strided_slice %22 {offsets = [2, 1, 0], sizes = [1, 1, 4], strides = [1, 1, 1]} : vector<3x3x4xf32> to vector<1x1x4xf32>
    %78 = vector.shape_cast %77 : vector<1x1x4xf32> to vector<4xf32>
    %79 = vector.shape_cast %78 : vector<4xf32> to vector<1x1x4xf32>
    %80 = vector.broadcast %79 : vector<1x1x4xf32> to vector<16x16x4xf32>
    %81 = arith.mulf %76, %80 : vector<16x16x4xf32>
    %82 = arith.addf %75, %81 : vector<16x16x4xf32>
    %83 = vector.extract_strided_slice %21 {offsets = [2, 0, 0], sizes = [16, 16, 4], strides = [1, 1, 1]} : vector<18x16x4xf32> to vector<16x16x4xf32>
    %84 = vector.extract_strided_slice %22 {offsets = [2, 2, 0], sizes = [1, 1, 4], strides = [1, 1, 1]} : vector<3x3x4xf32> to vector<1x1x4xf32>
    %85 = vector.shape_cast %84 : vector<1x1x4xf32> to vector<4xf32>
    %86 = vector.shape_cast %85 : vector<4xf32> to vector<1x1x4xf32>
    %87 = vector.broadcast %86 : vector<1x1x4xf32> to vector<16x16x4xf32>
    %88 = arith.mulf %83, %87 : vector<16x16x4xf32>
    %89 = arith.addf %82, %88 : vector<16x16x4xf32>
    %c0_21 = arith.constant 0 : index
    %c0_22 = arith.constant 0 : index
    %c0_23 = arith.constant 0 : index
    %c0_24 = arith.constant 0 : index
    %90 = vector.load %arg8[%c0_21, %c0_22, %c0_23, %c0_24] : memref<1x16x16x4xf32, #tpu.memory_space<vmem>>, vector<1x16x16x4xf32>
    %91 = vector.shape_cast %90 : vector<1x16x16x4xf32> to vector<16x16x4xf32>
    %92 = vector.shape_cast %89 : vector<16x16x4xf32> to vector<1x16x16x4xf32>
    tpu.vector_store %arg8[%c0_21, %c0_22, %c0_23, %c0_24], %92 {strides = array<i32>} : memref<1x16x16x4xf32, #tpu.memory_space<vmem>>, vector<1x16x16x4xf32>,
    return
  }
  func.func @transform_0(%arg0: i32, %arg1: i32, %arg2: i32) -> (i32, i32, i32, i32) {
    %c0_i32 = arith.constant 0 : i32
    %c0_i32_0 = arith.constant 0 : i32
    return %arg0, %arg2, %c0_i32, %arg1 : i32, i32, i32, i32
  }
  func.func @transform_1(%arg0: i32, %arg1: i32, %arg2: i32) -> (i32, i32, i32, i32) {
    %c16_i32 = arith.constant 16 : i32
    %0 = arith.muli %arg2, %c16_i32 : i32
    %c1_i32 = arith.constant 1 : i32
    %1 = arith.subi %0, %c1_i32 : i32
    %c0_i32 = arith.constant 0 : i32
    %2 = arith.maxsi %1, %c0_i32 : i32
    %c0_i32_0 = arith.constant 0 : i32
    %c0_i32_1 = arith.constant 0 : i32
    return %arg0, %2, %c0_i32_0, %arg1 : i32, i32, i32, i32
  }
  func.func @transform_2(%arg0: i32, %arg1: i32, %arg2: i32) -> (i32, i32, i32, i32) {
    %c16_i32 = arith.constant 16 : i32
    %0 = arith.muli %arg2, %c16_i32 : i32
    %c16_i32_0 = arith.constant 16 : i32
    %1 = arith.addi %0, %c16_i32_0 : i32
    %c15_i32 = arith.constant 15 : i32
    %2 = arith.minsi %1, %c15_i32 : i32
    %c0_i32 = arith.constant 0 : i32
    %c0_i32_1 = arith.constant 0 : i32
    return %arg0, %2, %c0_i32, %arg1 : i32, i32, i32, i32
  }
  func.func @transform_3(%arg0: i32, %arg1: i32, %arg2: i32) -> (i32, i32, i32) {
    %c0_i32 = arith.constant 0 : i32
    %c0_i32_0 = arith.constant 0 : i32
    %c0_i32_1 = arith.constant 0 : i32
    return %c0_i32, %c0_i32_0, %arg1 : i32, i32, i32
  }
  func.func @transform_4(%arg0: i32, %arg1: i32, %arg2: i32) -> (i32, i32) {
    %c0_i32 = arith.constant 0 : i32
    %c0_i32_0 = arith.constant 0 : i32
    return %c0_i32, %arg1 : i32, i32
  }
  func.func @transform_5(%arg0: i32, %arg1: i32, %arg2: i32) -> (i32, i32, i32, i32) {
    %c0_i32 = arith.constant 0 : i32
    %c0_i32_0 = arith.constant 0 : i32
    return %arg0, %arg2, %c0_i32, %arg1 : i32, i32, i32, i32
  }
}

</mosaic_0001>

<bundles_post_ra>
// kernel: tpu_custom_call.1
= control target key start
LH: loop header
LB: loop body
LE: loop exit
PB: predicated region body
PF: predicated region fallthrough
CT: control target
= control target key end

     0   :  { %s1717_s18 = smov 0   ;;  %s1719_s19 = smov 0   ;;  %s2559_s0 = inlined_call_operand.vmem [shape: f32[2,16,16,4], index: 0, kind: input, shape index: {}]   ;;  %s2560_s1 = inlined_call_operand.vmem [shape: f32[2,16,16,4], index: 1, kind: input, shape index: {}]   ;;  %s2561_s2 = inlined_call_operand.vmem [shape: f32[2,16,16,4], index: 2, kind: input, shape index: {}]   ;;  %s2562_s3 = inlined_call_operand.vmem [shape: f32[3,3,4], index: 3, kind: input, shape index: {}]   ;;  %s2563_s4 = inlined_call_operand.vmem [shape: f32[1,4], index: 4, kind: input, shape index: {}]   ;;  %s2564_s5 = inlined_call_operand.vmem [shape: f32[2,16,16,4], index: 5, kind: output, shape index: {}]  }
   0x1   :  { %s1721_s20 = smov 0  }
   0x2 LB: > { %s34_s21 = sadd.s32 1, %s1681_s19  ;;  %p1620_p0 = scmp.ge.s32.totalorder %s1685_s20, 1  ;;  %s1685_s20 = sphi %s1721_s20, %s15_s20   ;;  %s1681_s19 = sphi %s1719_s19, %s2566_s19   ;;  %s1677_s18 = sphi %s1717_s18, %s2565_s18  }
   0x3   : > { %p36_p1 = scmp.ge.s32.totalorder %s34_s21, 2  ;;  %p314_p2 = scmp.lt.s32.totalorder %s1685_s20, 3 }
   0x5   : > { %s2568_s21 = smov (%p36_p1, %s34_s21), 0  ;;  %p315_p3 = pnand %p1620_p0, %p314_p2 }
   0x6   : > { %p398_p4 = scmp.lt.s32.totalorder (!%p315_p3), %s1677_s18, 1  ;;  %v782_v0 = vlaneseq (!%p315_p3)  ;;  %v772_v2 = vld [vmem:[%s2562_s3] sm:$0x7] (!%p315_p3)  ;;  %v773_v6 = vld [vmem:[%s2562_s3 + $0x4] sm:$0x7] (!%p315_p3)  ;;  %vm554_vm0 = vcmask (!%p315_p3), 1040384  }
   0x7   : > { %318 = sbr.rel (%p315_p3) target bundleno = 206 (0xce), region = 40  ;;  %vm663_vm1 = vcmask (!%p315_p3), 1046528   ;;  %v1784_v30 = vld [vmem:[%s2563_s4] ss:$0 sm:$0xff] (!%p315_p3)  ;;  %v774_v37 = vld [vmem:[%s2562_s3 + $0x8] sm:$0x7] (!%p315_p3) }
   0x8   : > { %v783_v1 = vshrl.u32 (!%p315_p3), %v782_v0, 7  ;;  %vm1394_vm2 = vcmask (!%p315_p3), 31744  }
   0xa   : > { %v784_v3 = vsub.s32 (!%p315_p3), 0, %v783_v1  ;;  %v852_v4 = vsub.s32 (!%p315_p3), 1, %v783_v1  ;;  %v920_v5 = vsub.s32 (!%p315_p3), 2, %v783_v1 }
   0xc   : > { %v1756_v10 = vrot.slane (!%p315_p3), %v772_v2, %v784_v3  ;;  %v1758_v11 = vrot.slane (!%p315_p3), %v772_v2, %v852_v4  ;;  %v1767_v17 = vrot.slane (!%p315_p3), %v772_v2, %v920_v5  ;;  %v1776_v26 = vrot.slane (!%p315_p3), %v773_v6, %v784_v3 }
   0xd   : > { %v1786_v31 = vrot.slane (!%p315_p3), %v773_v6, %v852_v4  ;;  %v1809_v48 = vrot.slane (!%p315_p3), %v773_v6, %v920_v5  ;;  %v1814_v51 = vrot.slane (!%p315_p3), %v774_v37, %v784_v3  ;;  %v1816_v52 = vrot.slane (!%p315_p3), %v774_v37, %v852_v4 }
   0xe   : > { %s2570_s18 = smov (!%p398_p4, %s1677_s18), 1  ;;  %v1820_v55 = vrot.slane %v774_v37, %v920_v5 }
   0xf   : > { %s1738_s24 = sshll.u32 %s2570_s18, 8 }
  0x10   : > { %s1744_s27 = scalar_lea.vmem %s2559_s0, %s1738_s24  ;;  %s426_s30 = scalar_lea.vmem %s2560_s1, %s1738_s24 }
  0x11   : > { %v476_v7 = vld [vmem:[%s426_s30] sm:$0xff]  ;;  %v477_v8 = vld [vmem:[%s426_s30 + $0x8] sm:$0xff]  ;;  %v1764_v15 = vld [vmem:[%s1744_s27 + $0x10] sm:$0xff]  ;;  %s1884_s14 = scalar_lea.vmem %s2564_s5, %s1738_s24  ;;  %s1635_s17 = sadd.s32 240, %s1738_s24 }
  0x12   : > { %v1754_v9 = vld [vmem:[%s1744_s27] sm:$0xff]  ;;  %v479_v12 = vmul.f32 0.0, %v476_v7  ;;  %v480_v13 = vmul.f32 0.0, %v477_v8  ;;  %v1761_v14 = vld [vmem:[%s1744_s27 + $0x8] sm:$0xff]  ;;  %v561_v18 = vrot.slane %v1764_v15, 7  ;;  %v670_v21 = vrot.slane %v1764_v15, 1  ;;  %s446_s23 = scalar_lea.vmem %s2561_s2, %s1635_s17 }
  0x13   : > { %v558_v16 = vrot.slane %v1754_v9, 7  ;;  %v667_v19 = vrot.slane %v1754_v9, 1  ;;  %v668_v20 = vrot.slane %v1761_v14, 1  ;;  %v1774_v22 = vld [vmem:[%s1744_s27 + $0x18] sm:$0xff]  ;;  %v858_v40 = vmul.f32 %v1758_v11, %v1764_v15 }
  0x14   : > { %v555_v23 = vrot.slane %v479_v12, 7  ;;  %v664_v24 = vrot.slane %v479_v12, 1  ;;  %v665_v25 = vrot.slane %v480_v13, 1  ;;  %v647_v28 = vsel %vm554_vm0, 0.0, %v561_v18 }
  0x15   : > { %v646_v27 = vsel %vm554_vm0, 0.0, %v558_v16  ;;  %v671_v29 = vrot.slane %v1774_v22, 1  ;;  %v669_v34 = vsel %vm663_vm1, %v667_v19, %v668_v20  ;;  %v790_v35 = vmul.f32 %v1756_v10, %v647_v28 }
  0x16   : > { %v645_v32 = vsel %vm554_vm0, 0.0, %v555_v23  ;;  %v666_v33 = vsel %vm663_vm1, %v664_v24, %v665_v25  ;;  %v854_v39 = vmul.f32 %v1758_v11, %v479_v12  ;;  %v788_v41 = vmul.f32 %v1756_v10, %v646_v27 }
  0x17   : > { %v672_v36 = vsel %vm663_vm1, %v670_v21, %v671_v29  ;;  %v786_v38 = vmul.f32 %v1756_v10, %v645_v32  ;;  %v822_v42 = vadd.f32 %v1784_v30, %v790_v35  ;;  %v922_v43 = vmul.f32 %v1767_v17, %v666_v33 }
  0x18   : > { %v926_v44 = vmul.f32 %v1767_v17, %v672_v36  ;;  %v1806_v46 = vmul.f32 %v1767_v17, %v669_v34  ;;  %v990_v47 = vmul.f32 %v1776_v26, %v646_v27  ;;  %v1812_v50 = vmul.f32 %v1776_v26, %v647_v28 }
  0x19   : > { %v818_v45 = vadd.f32 %v1784_v30, %v786_v38  ;;  %v890_v49 = vadd.f32 %v858_v40, %v822_v42  ;;  %v1058_v54 = vmul.f32 %v1786_v31, %v1754_v9  ;;  %v556_v56 = vrot.slane %v480_v13, 7 }
  0x1a   : > { %v1126_v58 = vmul.f32 %v1809_v48, %v669_v34  ;;  %v1826_v59 = vmul.f32 %v1809_v48, %v672_v36  ;;  %v1194_v60 = vmul.f32 %v1814_v51, %v647_v28  ;;  %v559_v63 = vrot.slane %v1761_v14, 7 }
  0x1b   : > { %v886_v53 = vadd.f32 %v854_v39, %v818_v45  ;;  %v1822_v57 = vadd.f32 %v926_v44, %v890_v49  ;;  %v557_v62 = vsel %vm554_vm0, %v555_v23, %v556_v56  ;;  %v562_v0 = vrot.slane %v1774_v22, 7 }
  0x1c   : > { %v1262_v1 = vmul.f32 %v1816_v52, %v1764_v15  ;;  %v754_v2 = vsel %vm663_vm1, %v665_v25, 0.0  ;;  %v755_v3 = vsel %vm663_vm1, %v668_v20, 0.0  ;;  %v787_v4 = vmul.f32 %v1756_v10, %v557_v62 }
  0x1d   : > { %v954_v61 = vadd.f32 %v922_v43, %v886_v53  ;;  %v560_v6 = vsel %vm554_vm0, %v558_v16, %v559_v63  ;;  %v563_v7 = vsel %vm554_vm0, %v561_v18, %v562_v0  ;;  %v855_v8 = vmul.f32 %v1758_v11, %v480_v13  ;;  %v1868_v43 = vld [vmem:[%s1744_s27 + $0x28] sm:$0xff] }
  0x1e   : > { %v756_v12 = vsel %vm663_vm1, %v671_v29, 0.0  ;;  %v791_v19 = vmul.f32 %v1756_v10, %v563_v7  ;;  %v819_v21 = vadd.f32 %v1784_v30, %v787_v4  ;;  %v859_v20 = vmul.f32 %v1758_v11, %v1774_v22  ;;  %v1854_v29 = vld [vmem:[%s1744_s27 + $0x20] sm:$0xff] }
  0x1f   : > { %v1022_v5 = vadd.f32 %v990_v47, %v954_v61  ;;  %v1330_v24 = vmul.f32 %v1820_v55, %v672_v36  ;;  %v789_v16 = vmul.f32 %v1756_v10, %v560_v6  ;;  %v923_v25 = vmul.f32 %v1767_v17, %v754_v2 }
  0x20   : > { %v823_v13 = vadd.f32 %v1784_v30, %v791_v19  ;;  %v887_v18 = vadd.f32 %v855_v8, %v819_v21  ;;  %v1850_v27 = vmul.f32 %v1767_v17, %v755_v3  ;;  %v991_v28 = vmul.f32 %v1776_v26, %v560_v6 }
  0x21   : > { %v1090_v23 = vadd.f32 %v1058_v54, %v1022_v5  ;;  %v927_v33 = vmul.f32 %v1767_v17, %v756_v12  ;;  %v1858_v34 = vmul.f32 %v1776_v26, %v563_v7  ;;  %v1059_v35 = vmul.f32 %v1786_v31, %v1761_v14 }
  0x22   : > { %v891_v36 = vadd.f32 %v859_v20, %v823_v13  ;;  %v955_v37 = vadd.f32 %v923_v25, %v887_v18  ;;  %v1127_v38 = vmul.f32 %v1809_v48, %v755_v3  ;;  %v1864_v39 = vmul.f32 %v1809_v48, %v756_v12 }
  0x23   : > { %v1158_v32 = vadd.f32 %v1126_v58, %v1090_v23  ;;  %v1195_v42 = vmul.f32 %v1814_v51, %v563_v7  ;;  %v564_v44 = vrot.slane %v1854_v29, 7  ;;  %v673_v45 = vrot.slane %v1854_v29, 1 }
  0x24   : > { %v1023_v47 = vadd.f32 %v991_v28, %v955_v37  ;;  %v1263_v49 = vmul.f32 %v1816_v52, %v1774_v22  ;;  %v674_v53 = vrot.slane %v1868_v43, 1  ;;  %v820_v54 = vadd.f32 %v1784_v30, %v788_v41 }
  0x25   : > { %v1226_v40 = vadd.f32 %v1194_v60, %v1158_v32  ;;  %v1331_v58 = vmul.f32 %v1820_v55, %v756_v12  ;;  %v648_v60 = vsel %vm554_vm0, 0.0, %v564_v44  ;;  %v856_v61 = vmul.f32 %v1758_v11, %v1754_v9 }
  0x26   : > { %v1091_v62 = vadd.f32 %v1059_v35, %v1023_v47  ;;  %v675_v63 = vsel %vm663_vm1, %v673_v45, %v674_v53  ;;  %v792_v0 = vmul.f32 %v1756_v10, %v648_v60  ;;  %v860_v41 = vmul.f32 %v1758_v11, %v1854_v29 }
  0x27   : > { %v1294_v56 = vadd.f32 %v1262_v1, %v1226_v40  ;;  %v1890_v2 = vadd.f32 %v927_v33, %v891_v36  ;;  %v888_v3 = vadd.f32 %v856_v61, %v820_v54  ;;  %v994_v9 = vmul.f32 %v1776_v26, %v648_v60  ;;  %v1930_v54 = vld [vmem:[%s1744_s27 + $0x38] sm:$0xff] }
  0x28   : > { %v1159_v4 = vadd.f32 %v1127_v38, %v1091_v62  ;;  %v824_v5 = vadd.f32 %v1784_v30, %v792_v0  ;;  %v928_v6 = vmul.f32 %v1767_v17, %v675_v63  ;;  %v1060_v7 = vmul.f32 %v1786_v31, %v1764_v15  ;;  %v1919_v38 = vld [vmem:[%s1744_s27 + $0x30] sm:$0xff] }
  0x29   : > { %v1362_v1 = vadd.f32 %v1330_v24, %v1294_v56  ;;  %v956_v8 = vadd.f32 %v1806_v46, %v888_v3  ;;  %v1130_v12 = vmul.f32 %v1809_v48, %v675_v63  ;;  %v1196_v19 = vmul.f32 %v1814_v51, %v648_v60 }
  0x2a   : > { %v565_v21 = vrot.slane %v1868_v43, 7  ;;  %v1227_v20 = vadd.f32 %v1195_v42, %v1159_v4  ;;  %v892_v23 = vadd.f32 %v860_v41, %v824_v5  ;;  %v757_v24 = vsel %vm663_vm1, %v674_v53, 0.0 }
  0x2b   : > { %1395 = vst.msk [vmem:[%s1884_s14] sm:$0xff] %vm1394_vm2, %v1362_v1  ;;  %v821_v25 = vadd.f32 %v1784_v30, %v789_v16  ;;  %v1024_v13 = vadd.f32 %v1812_v50, %v956_v8  ;;  %v1264_v15 = vmul.f32 %v1816_v52, %v1854_v29  ;;  %v857_v18 = vmul.f32 %v1758_v11, %v1761_v14 }
  0x2c   : > { %v566_v46 = vsel %vm554_vm0, %v564_v44, %v565_v21  ;;  %v1295_v28 = vadd.f32 %v1263_v49, %v1227_v20  ;;  %v1332_v32 = vmul.f32 %v1820_v55, %v675_v63  ;;  %v861_v16 = vmul.f32 %v1758_v11, %v1868_v43 }
  0x2d   : > { %v793_v33 = vmul.f32 %v1756_v10, %v566_v46  ;;  %v1915_v35 = vadd.f32 %v928_v6, %v892_v23  ;;  %v1092_v50 = vadd.f32 %v1060_v7, %v1024_v13  ;;  %v889_v36 = vadd.f32 %v857_v18, %v821_v25 }
  0x2e   : > { %v929_v37 = vmul.f32 %v1767_v17, %v757_v24  ;;  %v1363_v40 = vadd.f32 %v1331_v58, %v1295_v28  ;;  %v995_v42 = vmul.f32 %v1776_v26, %v566_v46  ;;  %v1061_v44 = vmul.f32 %v1786_v31, %v1774_v22 }
  0x2f   : > { %v825_v14 = vadd.f32 %v1784_v30, %v793_v33  ;;  %v1160_v45 = vadd.f32 %v1826_v59, %v1092_v50  ;;  %v957_v47 = vadd.f32 %v1850_v27, %v889_v36  ;;  %v1131_v49 = vmul.f32 %v1809_v48, %v757_v24 }
  0x30   : > { %v1197_v53 = vmul.f32 %v1814_v51, %v566_v46  ;;  %1396 = vst.msk [vmem:[%s1884_s14 + $0x8] sm:$0xff] %vm1394_vm2, %v1363_v40  ;;  %v567_v58 = vrot.slane %v1919_v38, 7  ;;  %v676_v60 = vrot.slane %v1919_v38, 1  ;;  %v677_v61 = vrot.slane %v1930_v54, 1 }
  0x31   : > { %v893_v56 = vadd.f32 %v861_v16, %v825_v14  ;;  %v1228_v22 = vadd.f32 %v1196_v19, %v1160_v45  ;;  %v1025_v59 = vadd.f32 %v1858_v34, %v957_v47  ;;  %v1265_v27 = vmul.f32 %v1816_v52, %v1868_v43 }
  0x32   : > { %v1026_v62 = vadd.f32 %v994_v9, %v1822_v57  ;;  %v1333_v63 = vmul.f32 %v1820_v55, %v757_v24  ;;  %v649_v0 = vsel %vm554_vm0, 0.0, %v567_v58  ;;  %v678_v41 = vsel %vm663_vm1, %v676_v60, %v677_v61 }
  0x33   : > { %v1062_v1 = vmul.f32 %v1786_v31, %v1854_v29  ;;  %v1296_v3 = vadd.f32 %v1264_v15, %v1228_v22  ;;  %v1093_v4 = vadd.f32 %v1061_v44, %v1025_v59  ;;  %v794_v5 = vmul.f32 %v1756_v10, %v649_v0 }
  0x34   : > { %v862_v34 = vmul.f32 %v1758_v11, %v1919_v38  ;;  %v1949_v6 = vadd.f32 %v929_v37, %v893_v56  ;;  %v930_v57 = vmul.f32 %v1767_v17, %v678_v41  ;;  %v1198_v7 = vmul.f32 %v1814_v51, %v649_v0  ;;  %v1973_v37 = vld [vmem:[%s1744_s27 + $0x40] sm:$0xff] }
  0x35   : > { %v1094_v9 = vadd.f32 %v1062_v1, %v1026_v62  ;;  %v1364_v8 = vadd.f32 %v1332_v32, %v1296_v3  ;;  %v1161_v19 = vadd.f32 %v1864_v39, %v1093_v4  ;;  %v826_v29 = vadd.f32 %v1784_v30, %v794_v5 }
  0x36   : > { %v996_v21 = vmul.f32 %v1776_v26, %v649_v0  ;;  %v1266_v23 = vmul.f32 %v1816_v52, %v1919_v38  ;;  %v568_v24 = vrot.slane %v1930_v54, 7  ;;  %v758_v25 = vsel %vm663_vm1, %v677_v61, 0.0 }
  0x37   : > { %v1162_v20 = vadd.f32 %v1130_v12, %v1094_v9  ;;  %1397 = vst.msk [vmem:[%s1884_s14 + $0x10] sm:$0xff] %vm1394_vm2, %v1364_v8  ;;  %v1229_v13 = vadd.f32 %v1197_v53, %v1161_v19  ;;  %v894_v15 = vadd.f32 %v862_v34, %v826_v29  ;;  %v1132_v46 = vmul.f32 %v1809_v48, %v678_v41 }
  0x38   : > { %v1334_v39 = vmul.f32 %v1820_v55, %v678_v41  ;;  %v569_v28 = vsel %vm554_vm0, %v567_v58, %v568_v24  ;;  %v1027_v12 = vadd.f32 %v995_v42, %v1890_v2  ;;  %v1063_v32 = vmul.f32 %v1786_v31, %v1868_v43  ;;  %v1983_v58 = vld [vmem:[%s1744_s27 + $0x48] sm:$0xff] }
  0x39   : > { %v1230_v18 = vadd.f32 %v1198_v7, %v1162_v20  ;;  %v1297_v33 = vadd.f32 %v1265_v27, %v1229_v13  ;;  %v795_v16 = vmul.f32 %v1756_v10, %v569_v28  ;;  %v863_v50 = vmul.f32 %v1758_v11, %v1930_v54 }
  0x3a   : > { %v931_v36 = vmul.f32 %v1767_v17, %v758_v25  ;;  %v1975_v40 = vadd.f32 %v930_v57, %v894_v15  ;;  %v1095_v44 = vadd.f32 %v1063_v32, %v1027_v12  ;;  %v1199_v2 = vmul.f32 %v1814_v51, %v569_v28  ;;  %v2022_v12 = vld [vmem:[%s1744_s27 + $0x50] sm:$0xff] }
  0x3b   : > { %v1298_v14 = vadd.f32 %v1266_v23, %v1230_v18  ;;  %v1365_v43 = vadd.f32 %v1333_v63, %v1297_v33  ;;  %v827_v42 = vadd.f32 %v1784_v30, %v795_v16  ;;  %v997_v45 = vmul.f32 %v1776_v26, %v569_v28 }
  0x3c   : > { %v1267_v47 = vmul.f32 %v1816_v52, %v1930_v54  ;;  %v1163_v56 = vadd.f32 %v1131_v49, %v1095_v44  ;;  %v570_v60 = vrot.slane %v1973_v37, 7  ;;  %v679_v61 = vrot.slane %v1973_v37, 1 }
  0x3d   : > { %v1366_v53 = vadd.f32 %v1334_v39, %v1298_v14  ;;  %1398 = vst.msk [vmem:[%s1884_s14 + $0x18] sm:$0xff] %vm1394_vm2, %v1365_v43  ;;  %v895_v22 = vadd.f32 %v863_v50, %v827_v42  ;;  %v1133_v59 = vmul.f32 %v1809_v48, %v758_v25  ;;  %v680_v27 = vrot.slane %v1983_v58, 1 }
  0x3e   : > { %v1028_v62 = vadd.f32 %v996_v21, %v1915_v35  ;;  %v1231_v63 = vadd.f32 %v1199_v2, %v1163_v56  ;;  %v1335_v49 = vmul.f32 %v1820_v55, %v758_v25  ;;  %v650_v0 = vsel %vm554_vm0, 0.0, %v570_v60  ;;  %v2032_v2 = vld [vmem:[%s1744_s27 + $0x58] sm:$0xff] }
  0x3f   : > { %1399 = vst.msk [vmem:[%s1884_s14 + $0x20] sm:$0xff] %vm1394_vm2, %v1366_v53  ;;  %v1064_v41 = vmul.f32 %v1786_v31, %v1919_v38  ;;  %v681_v1 = vsel %vm663_vm1, %v679_v61, %v680_v27  ;;  %v796_v3 = vmul.f32 %v1756_v10, %v650_v0  ;;  %v864_v4 = vmul.f32 %v1758_v11, %v1973_v37 }
  0x40   : > { %v1268_v35 = vmul.f32 %v1816_v52, %v1973_v37  ;;  %v963_v5 = vadd.f32 %v931_v36, %v895_v22  ;;  %v1299_v34 = vadd.f32 %v1267_v47, %v1231_v63  ;;  %v998_v57 = vmul.f32 %v1776_v26, %v650_v0 }
  0x41   : > { %v1096_v9 = vadd.f32 %v1064_v41, %v1028_v62  ;;  %v828_v7 = vadd.f32 %v1784_v30, %v796_v3  ;;  %v932_v38 = vmul.f32 %v1767_v17, %v681_v1  ;;  %v1200_v8 = vmul.f32 %v1814_v51, %v650_v0 }
  0x42   : > { %v571_v19 = vrot.slane %v1983_v58, 7  ;;  %v1367_v29 = vadd.f32 %v1335_v49, %v1299_v34  ;;  %v1134_v21 = vmul.f32 %v1809_v48, %v681_v1  ;;  %v759_v23 = vsel %vm663_vm1, %v680_v27, 0.0 }
  0x43   : > { %v1164_v20 = vadd.f32 %v1132_v46, %v1096_v9  ;;  %v896_v24 = vadd.f32 %v864_v4, %v828_v7  ;;  %v1336_v25 = vmul.f32 %v1820_v55, %v681_v1  ;;  %v1029_v15 = vadd.f32 %v997_v45, %v1949_v6 }
  0x44   : > { %v572_v13 = vsel %vm554_vm0, %v570_v60, %v571_v19  ;;  %1400 = vst.msk [vmem:[%s1884_s14 + $0x28] sm:$0xff] %vm1394_vm2, %v1367_v29  ;;  %v865_v28 = vmul.f32 %v1758_v11, %v1983_v58  ;;  %v1065_v46 = vmul.f32 %v1786_v31, %v1930_v54  ;;  %v933_v33 = vmul.f32 %v1767_v17, %v759_v23 }
  0x45   : > { %v1232_v39 = vadd.f32 %v1200_v8, %v1164_v20  ;;  %v797_v18 = vmul.f32 %v1756_v10, %v572_v13  ;;  %v2024_v32 = vadd.f32 %v932_v38, %v896_v24  ;;  %v999_v16 = vmul.f32 %v1776_v26, %v572_v13 }
  0x46   : > { %v1135_v6 = vmul.f32 %v1809_v48, %v759_v23  ;;  %v1097_v14 = vadd.f32 %v1065_v46, %v1029_v15  ;;  %v1201_v44 = vmul.f32 %v1814_v51, %v572_v13  ;;  %v1269_v54 = vmul.f32 %v1816_v52, %v1983_v58 }
  0x47   : > { %v1300_v50 = vadd.f32 %v1268_v35, %v1232_v39  ;;  %v829_v36 = vadd.f32 %v1784_v30, %v797_v18  ;;  %v573_v43 = vrot.slane %v2022_v12, 7  ;;  %v682_v42 = vrot.slane %v2022_v12, 1 }
  0x48   : > { %v683_v45 = vrot.slane %v2032_v2, 1  ;;  %v1165_v56 = vadd.f32 %v1133_v59, %v1097_v14  ;;  %v1030_v60 = vadd.f32 %v998_v57, %v1975_v40  ;;  %v1337_v61 = vmul.f32 %v1820_v55, %v759_v23 }
  0x49   : > { %v1368_v47 = vadd.f32 %v1336_v25, %v1300_v50  ;;  %v897_v53 = vadd.f32 %v865_v28, %v829_v36  ;;  %v651_v22 = vsel %vm554_vm0, 0.0, %v573_v43  ;;  %v1066_v62 = vmul.f32 %v1786_v31, %v1973_v37 }
  0x4a   : > { %v684_v27 = vsel %vm663_vm1, %v682_v42, %v683_v45  ;;  %v1233_v63 = vadd.f32 %v1201_v44, %v1165_v56  ;;  %v798_v49 = vmul.f32 %v1756_v10, %v651_v22  ;;  %v866_v0 = vmul.f32 %v1758_v11, %v2022_v12 }
  0x4b   : > { %1401 = vst.msk [vmem:[%s1884_s14 + $0x30] sm:$0xff] %vm1394_vm2, %v1368_v47  ;;  %v1270_v40 = vmul.f32 %v1816_v52, %v2022_v12  ;;  %v965_v59 = vadd.f32 %v933_v33, %v897_v53  ;;  %v934_v41 = vmul.f32 %v1767_v17, %v684_v27  ;;  %v1098_v1 = vadd.f32 %v1066_v62, %v1030_v60 }
  0x4c   : > { %v1202_v3 = vmul.f32 %v1814_v51, %v651_v22  ;;  %v1301_v4 = vadd.f32 %v1269_v54, %v1233_v63  ;;  %v830_v37 = vadd.f32 %v1784_v30, %v798_v49  ;;  %v1000_v35 = vmul.f32 %v1776_v26, %v651_v22 }
  0x4d   : > { %v574_v34 = vrot.slane %v2032_v2, 7  ;;  %v1136_v57 = vmul.f32 %v1809_v48, %v684_v27  ;;  %v1166_v9 = vadd.f32 %v1134_v21, %v1098_v1  ;;  %v760_v7 = vsel %vm663_vm1, %v683_v45, 0.0  ;;  %v2067_v21 = vld [vmem:[%s1744_s27 + $0x60] sm:$0xff] }
  0x4e   : > { %v1031_v38 = vadd.f32 %v999_v16, %v963_v5  ;;  %v1369_v8 = vadd.f32 %v1337_v61, %v1301_v4  ;;  %v898_v19 = vadd.f32 %v866_v0, %v830_v37  ;;  %v1338_v29 = vmul.f32 %v1820_v55, %v684_v27 }
  0x4f   : > { %v575_v20 = vsel %vm554_vm0, %v573_v43, %v574_v34  ;;  %v1234_v23 = vadd.f32 %v1202_v3, %v1166_v9  ;;  %v867_v25 = vmul.f32 %v1758_v11, %v2032_v2  ;;  %v1067_v13 = vmul.f32 %v1786_v31, %v1983_v58  ;;  %v2079_v58 = vld [vmem:[%s1744_s27 + $0x68] sm:$0xff] }
  0x50   : > { %v799_v24 = vmul.f32 %v1756_v10, %v575_v20  ;;  %1402 = vst.msk [vmem:[%s1884_s14 + $0x38] sm:$0xff] %vm1394_vm2, %v1369_v8  ;;  %v2071_v5 = vadd.f32 %v934_v41, %v898_v19  ;;  %v935_v15 = vmul.f32 %v1767_v17, %v760_v7  ;;  %v1001_v39 = vmul.f32 %v1776_v26, %v575_v20 }
  0x51   : > { %v1137_v18 = vmul.f32 %v1809_v48, %v760_v7  ;;  %v1302_v28 = vadd.f32 %v1270_v40, %v1234_v23  ;;  %v1099_v33 = vadd.f32 %v1067_v13, %v1031_v38  ;;  %v1203_v16 = vmul.f32 %v1814_v51, %v575_v20 }
  0x52   : > { %v831_v46 = vadd.f32 %v1784_v30, %v799_v24  ;;  %v1271_v50 = vmul.f32 %v1816_v52, %v2032_v2  ;;  %v576_v36 = vrot.slane %v2067_v21, 7  ;;  %v685_v14 = vrot.slane %v2067_v21, 1 }
  0x53   : > { %v686_v44 = vrot.slane %v2079_v58, 1  ;;  %v1370_v54 = vadd.f32 %v1338_v29, %v1302_v28  ;;  %v1167_v42 = vadd.f32 %v1135_v6, %v1099_v33  ;;  %v1032_v45 = vadd.f32 %v1000_v35, %v2024_v32 }
  0x54   : > { %v899_v43 = vadd.f32 %v867_v25, %v831_v46  ;;  %v1339_v47 = vmul.f32 %v1820_v55, %v760_v7  ;;  %v652_v53 = vsel %vm554_vm0, 0.0, %v576_v36  ;;  %v1068_v60 = vmul.f32 %v1786_v31, %v2022_v12 }
  0x55   : > { %v687_v56 = vsel %vm663_vm1, %v685_v14, %v686_v44  ;;  %1403 = vst.msk [vmem:[%s1884_s14 + $0x40] sm:$0xff] %vm1394_vm2, %v1370_v54  ;;  %v1235_v61 = vadd.f32 %v1203_v16, %v1167_v42  ;;  %v800_v22 = vmul.f32 %v1756_v10, %v652_v53  ;;  %v868_v27 = vmul.f32 %v1758_v11, %v2067_v21 }
  0x56   : > { %v1272_v32 = vmul.f32 %v1816_v52, %v2067_v21  ;;  %v967_v6 = vadd.f32 %v935_v15, %v899_v43  ;;  %v936_v62 = vmul.f32 %v1767_v17, %v687_v56  ;;  %v1100_v63 = vadd.f32 %v1068_v60, %v1032_v45 }
  0x57   : > { %v1204_v49 = vmul.f32 %v1814_v51, %v652_v53  ;;  %v1303_v0 = vadd.f32 %v1271_v50, %v1235_v61  ;;  %v832_v12 = vadd.f32 %v1784_v30, %v800_v22  ;;  %v1002_v40 = vmul.f32 %v1776_v26, %v652_v53 }
  0x58   : > { %v577_v41 = vrot.slane %v2079_v58, 7  ;;  %v1138_v1 = vmul.f32 %v1809_v48, %v687_v56  ;;  %v1168_v3 = vadd.f32 %v1136_v57, %v1100_v63  ;;  %v761_v4 = vsel %vm663_vm1, %v686_v44, 0.0  ;;  %v2114_v57 = vld [vmem:[%s1744_s27 + $0x70] sm:$0xff] }
  0x59   : > { %v1033_v37 = vadd.f32 %v1001_v39, %v965_v59  ;;  %v1371_v35 = vadd.f32 %v1339_v47, %v1303_v0  ;;  %v900_v34 = vadd.f32 %v868_v27, %v832_v12  ;;  %v1340_v9 = vmul.f32 %v1820_v55, %v687_v56 }
  0x5a   : > { %v578_v7 = vsel %vm554_vm0, %v576_v36, %v577_v41  ;;  %v1236_v38 = vadd.f32 %v1204_v49, %v1168_v3  ;;  %v869_v19 = vmul.f32 %v1758_v11, %v2079_v58  ;;  %v1069_v29 = vmul.f32 %v1786_v31, %v2032_v2  ;;  %v2126_v2 = vld [vmem:[%s1744_s27 + $0x78] sm:$0xff] }
  0x5b   : > { %v801_v8 = vmul.f32 %v1756_v10, %v578_v7  ;;  %1404 = vst.msk [vmem:[%s1884_s14 + $0x48] sm:$0xff] %vm1394_vm2, %v1371_v35  ;;  %v2118_v59 = vadd.f32 %v936_v62, %v900_v34  ;;  %v937_v20 = vmul.f32 %v1767_v17, %v761_v4  ;;  %v1003_v23 = vmul.f32 %v1776_v26, %v578_v7 }
  0x5c   : > { %v1139_v24 = vmul.f32 %v1809_v48, %v761_v4  ;;  %v1304_v25 = vadd.f32 %v1272_v32, %v1236_v38  ;;  %v1101_v15 = vadd.f32 %v1069_v29, %v1033_v37  ;;  %v1205_v39 = vmul.f32 %v1814_v51, %v578_v7 }
  0x5d   : > { %v833_v13 = vadd.f32 %v1784_v30, %v801_v8  ;;  %v1273_v28 = vmul.f32 %v1816_v52, %v2079_v58  ;;  %v579_v46 = vrot.slane %v2114_v57, 7  ;;  %v688_v33 = vrot.slane %v2114_v57, 1 }
  0x5e   : > { %v689_v16 = vrot.slane %v2126_v2, 1  ;;  %v1372_v50 = vadd.f32 %v1340_v9, %v1304_v25  ;;  %v1169_v14 = vadd.f32 %v1137_v18, %v1101_v15  ;;  %v1034_v44 = vadd.f32 %v1002_v40, %v2071_v5 }
  0x5f   : > { %v901_v36 = vadd.f32 %v869_v19, %v833_v13  ;;  %v1341_v54 = vmul.f32 %v1820_v55, %v761_v4  ;;  %v653_v43 = vsel %vm554_vm0, 0.0, %v579_v46  ;;  %v1070_v45 = vmul.f32 %v1786_v31, %v2067_v21 }
  0x60   : > { %v690_v42 = vsel %vm663_vm1, %v688_v33, %v689_v16  ;;  %1405 = vst.msk [vmem:[%s1884_s14 + $0x50] sm:$0xff] %vm1394_vm2, %v1372_v50  ;;  %v1237_v47 = vadd.f32 %v1205_v39, %v1169_v14  ;;  %v802_v53 = vmul.f32 %v1756_v10, %v653_v43  ;;  %v870_v56 = vmul.f32 %v1758_v11, %v2114_v57 }
  0x61   : > { %v1274_v5 = vmul.f32 %v1816_v52, %v2114_v57  ;;  %v969_v18 = vadd.f32 %v937_v20, %v901_v36  ;;  %v938_v60 = vmul.f32 %v1767_v17, %v690_v42  ;;  %v1102_v61 = vadd.f32 %v1070_v45, %v1034_v44 }
  0x62   : > { %v1206_v22 = vmul.f32 %v1814_v51, %v653_v43  ;;  %v1305_v27 = vadd.f32 %v1273_v28, %v1237_v47  ;;  %v834_v21 = vadd.f32 %v1784_v30, %v802_v53  ;;  %v1004_v32 = vmul.f32 %v1776_v26, %v653_v43 }
  0x63   : > { %v580_v62 = vrot.slane %v2126_v2, 7  ;;  %v1140_v63 = vmul.f32 %v1809_v48, %v690_v42  ;;  %v1170_v49 = vadd.f32 %v1138_v1, %v1102_v61  ;;  %v762_v0 = vsel %vm663_vm1, %v689_v16, 0.0  ;;  %v2161_v1 = vld [vmem:[%s1744_s27 + $0x80] sm:$0xff] }
  0x64   : > { %v1035_v12 = vadd.f32 %v1003_v23, %v967_v6  ;;  %v1373_v40 = vadd.f32 %v1341_v54, %v1305_v27  ;;  %v902_v41 = vadd.f32 %v870_v56, %v834_v21  ;;  %v1342_v3 = vmul.f32 %v1820_v55, %v690_v42 }
  0x65   : > { %v581_v4 = vsel %vm554_vm0, %v579_v46, %v580_v62  ;;  %v1238_v37 = vadd.f32 %v1206_v22, %v1170_v49  ;;  %v871_v34 = vmul.f32 %v1758_v11, %v2126_v2  ;;  %v1071_v9 = vmul.f32 %v1786_v31, %v2079_v58  ;;  %v2173_v58 = vld [vmem:[%s1744_s27 + $0x88] sm:$0xff] }
  0x66   : > { %v803_v35 = vmul.f32 %v1756_v10, %v581_v4  ;;  %1406 = vst.msk [vmem:[%s1884_s14 + $0x58] sm:$0xff] %vm1394_vm2, %v1373_v40  ;;  %v2165_v6 = vadd.f32 %v938_v60, %v902_v41  ;;  %v939_v7 = vmul.f32 %v1767_v17, %v762_v0  ;;  %v1005_v38 = vmul.f32 %v1776_v26, %v581_v4 }
  0x67   : > { %v1141_v8 = vmul.f32 %v1809_v48, %v762_v0  ;;  %v1306_v19 = vadd.f32 %v1274_v5, %v1238_v37  ;;  %v1103_v20 = vadd.f32 %v1071_v9, %v1035_v12  ;;  %v1207_v23 = vmul.f32 %v1814_v51, %v581_v4 }
  0x68   : > { %v835_v29 = vadd.f32 %v1784_v30, %v803_v35  ;;  %v1275_v25 = vmul.f32 %v1816_v52, %v2126_v2  ;;  %v582_v13 = vrot.slane %v2161_v1, 7  ;;  %v691_v15 = vrot.slane %v2161_v1, 1 }
  0x69   : > { %v692_v39 = vrot.slane %v2173_v58, 1  ;;  %v1374_v28 = vadd.f32 %v1342_v3, %v1306_v19  ;;  %v1171_v33 = vadd.f32 %v1139_v24, %v1103_v20  ;;  %v1036_v16 = vadd.f32 %v1004_v32, %v2118_v59 }
  0x6a   : > { %v903_v46 = vadd.f32 %v871_v34, %v835_v29  ;;  %v1343_v50 = vmul.f32 %v1820_v55, %v762_v0  ;;  %v654_v36 = vsel %vm554_vm0, 0.0, %v582_v13  ;;  %v1072_v44 = vmul.f32 %v1786_v31, %v2114_v57 }
  0x6b   : > { %v693_v14 = vsel %vm663_vm1, %v691_v15, %v692_v39  ;;  %1407 = vst.msk [vmem:[%s1884_s14 + $0x60] sm:$0xff] %vm1394_vm2, %v1374_v28  ;;  %v1239_v54 = vadd.f32 %v1207_v23, %v1171_v33  ;;  %v804_v43 = vmul.f32 %v1756_v10, %v654_v36  ;;  %v872_v42 = vmul.f32 %v1758_v11, %v2161_v1 }
  0x6c   : > { %v1276_v59 = vmul.f32 %v1816_v52, %v2161_v1  ;;  %v971_v24 = vadd.f32 %v939_v7, %v903_v46  ;;  %v940_v45 = vmul.f32 %v1767_v17, %v693_v14  ;;  %v1104_v47 = vadd.f32 %v1072_v44, %v1036_v16 }
  0x6d   : > { %v1208_v53 = vmul.f32 %v1814_v51, %v654_v36  ;;  %v1307_v56 = vadd.f32 %v1275_v25, %v1239_v54  ;;  %v836_v57 = vadd.f32 %v1784_v30, %v804_v43  ;;  %v1006_v5 = vmul.f32 %v1776_v26, %v654_v36 }
  0x6e   : > { %v583_v60 = vrot.slane %v2173_v58, 7  ;;  %v1142_v61 = vmul.f32 %v1809_v48, %v693_v14  ;;  %v1172_v22 = vadd.f32 %v1140_v63, %v1104_v47  ;;  %v763_v27 = vsel %vm663_vm1, %v692_v39, 0.0  ;;  %v2208_v63 = vld [vmem:[%s1744_s27 + $0x90] sm:$0xff] }
  0x6f   : > { %v1037_v21 = vadd.f32 %v1005_v38, %v969_v18  ;;  %v1375_v32 = vadd.f32 %v1343_v50, %v1307_v56  ;;  %v904_v62 = vadd.f32 %v872_v42, %v836_v57  ;;  %v1344_v49 = vmul.f32 %v1820_v55, %v693_v14 }
  0x70   : > { %v584_v0 = vsel %vm554_vm0, %v582_v13, %v583_v60  ;;  %v1240_v12 = vadd.f32 %v1208_v53, %v1172_v22  ;;  %v873_v41 = vmul.f32 %v1758_v11, %v2173_v58  ;;  %v1073_v3 = vmul.f32 %v1786_v31, %v2126_v2  ;;  %v2220_v2 = vld [vmem:[%s1744_s27 + $0x98] sm:$0xff] }
  0x71   : > { %v805_v40 = vmul.f32 %v1756_v10, %v584_v0  ;;  %1408 = vst.msk [vmem:[%s1884_s14 + $0x68] sm:$0xff] %vm1394_vm2, %v1375_v32  ;;  %v2212_v18 = vadd.f32 %v940_v45, %v904_v62  ;;  %v941_v4 = vmul.f32 %v1767_v17, %v763_v27  ;;  %v1007_v37 = vmul.f32 %v1776_v26, %v584_v0 }
  0x72   : > { %v1143_v35 = vmul.f32 %v1809_v48, %v763_v27  ;;  %v1308_v34 = vadd.f32 %v1276_v59, %v1240_v12  ;;  %v1105_v7 = vadd.f32 %v1073_v3, %v1037_v21  ;;  %v1209_v38 = vmul.f32 %v1814_v51, %v584_v0 }
  0x73   : > { %v837_v9 = vadd.f32 %v1784_v30, %v805_v40  ;;  %v1277_v19 = vmul.f32 %v1816_v52, %v2173_v58  ;;  %v585_v29 = vrot.slane %v2208_v63, 7  ;;  %v694_v20 = vrot.slane %v2208_v63, 1 }
  0x74   : > { %v695_v23 = vrot.slane %v2220_v2, 1  ;;  %v1376_v25 = vadd.f32 %v1344_v49, %v1308_v34  ;;  %v1173_v15 = vadd.f32 %v1141_v8, %v1105_v7  ;;  %v1038_v39 = vadd.f32 %v1006_v5, %v2165_v6 }
  0x75   : > { %v905_v13 = vadd.f32 %v873_v41, %v837_v9  ;;  %v1345_v28 = vmul.f32 %v1820_v55, %v763_v27  ;;  %v655_v46 = vsel %vm554_vm0, 0.0, %v585_v29  ;;  %v1074_v16 = vmul.f32 %v1786_v31, %v2161_v1 }
  0x76   : > { %v696_v33 = vsel %vm663_vm1, %v694_v20, %v695_v23  ;;  %1409 = vst.msk [vmem:[%s1884_s14 + $0x70] sm:$0xff] %vm1394_vm2, %v1376_v25  ;;  %v1241_v50 = vadd.f32 %v1209_v38, %v1173_v15  ;;  %v806_v36 = vmul.f32 %v1756_v10, %v655_v46  ;;  %v874_v14 = vmul.f32 %v1758_v11, %v2208_v63 }
  0x77   : > { %v1278_v6 = vmul.f32 %v1816_v52, %v2208_v63  ;;  %v973_v8 = vadd.f32 %v941_v4, %v905_v13  ;;  %v942_v44 = vmul.f32 %v1767_v17, %v696_v33  ;;  %v1106_v54 = vadd.f32 %v1074_v16, %v1038_v39 }
  0x78   : > { %v1210_v43 = vmul.f32 %v1814_v51, %v655_v46  ;;  %v1309_v42 = vadd.f32 %v1277_v19, %v1241_v50  ;;  %v838_v1 = vadd.f32 %v1784_v30, %v806_v36  ;;  %v1008_v59 = vmul.f32 %v1776_v26, %v655_v46 }
  0x79   : > { %v586_v45 = vrot.slane %v2220_v2, 7  ;;  %v1144_v47 = vmul.f32 %v1809_v48, %v696_v33  ;;  %v1174_v53 = vadd.f32 %v1142_v61, %v1106_v54  ;;  %v764_v56 = vsel %vm663_vm1, %v695_v23, 0.0  ;;  %v2255_v61 = vld [vmem:[%s1744_s27 + $0xa0] sm:$0xff] }
  0x7a   : > { %v1039_v57 = vadd.f32 %v1007_v37, %v971_v24  ;;  %v1377_v5 = vadd.f32 %v1345_v28, %v1309_v42  ;;  %v906_v60 = vadd.f32 %v874_v14, %v838_v1  ;;  %v1346_v22 = vmul.f32 %v1820_v55, %v696_v33 }
  0x7b   : > { %v587_v27 = vsel %vm554_vm0, %v585_v29, %v586_v45  ;;  %v1242_v21 = vadd.f32 %v1210_v43, %v1174_v53  ;;  %v875_v62 = vmul.f32 %v1758_v11, %v2220_v2  ;;  %v1075_v49 = vmul.f32 %v1786_v31, %v2173_v58  ;;  %v2267_v58 = vld [vmem:[%s1744_s27 + $0xa8] sm:$0xff] }
  0x7c   : > { %v807_v32 = vmul.f32 %v1756_v10, %v587_v27  ;;  %1410 = vst.msk [vmem:[%s1884_s14 + $0x78] sm:$0xff] %vm1394_vm2, %v1377_v5  ;;  %v2259_v24 = vadd.f32 %v942_v44, %v906_v60  ;;  %v943_v0 = vmul.f32 %v1767_v17, %v764_v56  ;;  %v1009_v12 = vmul.f32 %v1776_v26, %v587_v27 }
  0x7d   : > { %v1145_v40 = vmul.f32 %v1809_v48, %v764_v56  ;;  %v1310_v41 = vadd.f32 %v1278_v6, %v1242_v21  ;;  %v1107_v4 = vadd.f32 %v1075_v49, %v1039_v57  ;;  %v1211_v37 = vmul.f32 %v1814_v51, %v587_v27 }
  0x7e   : > { %v839_v3 = vadd.f32 %v1784_v30, %v807_v32  ;;  %v1279_v34 = vmul.f32 %v1816_v52, %v2220_v2  ;;  %v588_v9 = vrot.slane %v2255_v61, 7  ;;  %v697_v7 = vrot.slane %v2255_v61, 1 }
  0x7f   : > { %v698_v38 = vrot.slane %v2267_v58, 1  ;;  %v1378_v19 = vadd.f32 %v1346_v22, %v1310_v41  ;;  %v1175_v20 = vadd.f32 %v1143_v35, %v1107_v4  ;;  %v1040_v23 = vadd.f32 %v1008_v59, %v2212_v18 }
  0x80   : > { %v907_v29 = vadd.f32 %v875_v62, %v839_v3  ;;  %v1347_v25 = vmul.f32 %v1820_v55, %v764_v56  ;;  %v656_v13 = vsel %vm554_vm0, 0.0, %v588_v9  ;;  %v1076_v39 = vmul.f32 %v1786_v31, %v2208_v63 }
  0x81   : > { %v699_v15 = vsel %vm663_vm1, %v697_v7, %v698_v38  ;;  %1411 = vst.msk [vmem:[%s1884_s14 + $0x80] sm:$0xff] %vm1394_vm2, %v1378_v19  ;;  %v1243_v28 = vadd.f32 %v1211_v37, %v1175_v20  ;;  %v808_v46 = vmul.f32 %v1756_v10, %v656_v13  ;;  %v876_v33 = vmul.f32 %v1758_v11, %v2255_v61 }
  0x82   : > { %v1280_v18 = vmul.f32 %v1816_v52, %v2255_v61  ;;  %v975_v35 = vadd.f32 %v943_v0, %v907_v29  ;;  %v944_v16 = vmul.f32 %v1767_v17, %v699_v15  ;;  %v1108_v50 = vadd.f32 %v1076_v39, %v1040_v23 }
  0x83   : > { %v1212_v36 = vmul.f32 %v1814_v51, %v656_v13  ;;  %v1311_v14 = vadd.f32 %v1279_v34, %v1243_v28  ;;  %v840_v63 = vadd.f32 %v1784_v30, %v808_v46  ;;  %v1010_v6 = vmul.f32 %v1776_v26, %v656_v13 }
  0x84   : > { %v589_v44 = vrot.slane %v2267_v58, 7  ;;  %v1146_v54 = vmul.f32 %v1809_v48, %v699_v15  ;;  %v1176_v43 = vadd.f32 %v1144_v47, %v1108_v50  ;;  %v765_v42 = vsel %vm663_vm1, %v698_v38, 0.0  ;;  %v2302_v47 = vld [vmem:[%s1744_s27 + $0xb0] sm:$0xff] }
  0x85   : > { %v1041_v1 = vadd.f32 %v1009_v12, %v973_v8  ;;  %v1379_v59 = vadd.f32 %v1347_v25, %v1311_v14  ;;  %v908_v45 = vadd.f32 %v876_v33, %v840_v63  ;;  %v1348_v53 = vmul.f32 %v1820_v55, %v699_v15 }
  0x86   : > { %v590_v56 = vsel %vm554_vm0, %v588_v9, %v589_v44  ;;  %v1244_v57 = vadd.f32 %v1212_v36, %v1176_v43  ;;  %v877_v60 = vmul.f32 %v1758_v11, %v2267_v58  ;;  %v1077_v22 = vmul.f32 %v1786_v31, %v2220_v2  ;;  %v2314_v2 = vld [vmem:[%s1744_s27 + $0xb8] sm:$0xff] }
  0x87   : > { %v809_v5 = vmul.f32 %v1756_v10, %v590_v56  ;;  %1412 = vst.msk [vmem:[%s1884_s14 + $0x88] sm:$0xff] %vm1394_vm2, %v1379_v59  ;;  %v2306_v8 = vadd.f32 %v944_v16, %v908_v45  ;;  %v945_v27 = vmul.f32 %v1767_v17, %v765_v42  ;;  %v1011_v21 = vmul.f32 %v1776_v26, %v590_v56 }
  0x88   : > { %v1147_v32 = vmul.f32 %v1809_v48, %v765_v42  ;;  %v1312_v62 = vadd.f32 %v1280_v18, %v1244_v57  ;;  %v1109_v0 = vadd.f32 %v1077_v22, %v1041_v1  ;;  %v1213_v12 = vmul.f32 %v1814_v51, %v590_v56 }
  0x89   : > { %v841_v49 = vadd.f32 %v1784_v30, %v809_v5  ;;  %v1281_v41 = vmul.f32 %v1816_v52, %v2267_v58  ;;  %v591_v3 = vrot.slane %v2302_v47, 7  ;;  %v700_v4 = vrot.slane %v2302_v47, 1 }
  0x8a   : > { %v701_v37 = vrot.slane %v2314_v2, 1  ;;  %v1380_v34 = vadd.f32 %v1348_v53, %v1312_v62  ;;  %v1177_v7 = vadd.f32 %v1145_v40, %v1109_v0  ;;  %v1042_v30 = vadd.f32 %v1010_v6, %v2259_v24 }
  0x8b   : > { %v909_v9 = vadd.f32 %v877_v60, %v841_v49  ;;  %v1349_v38 = vmul.f32 %v1820_v55, %v765_v42  ;;  %v657_v19 = vsel %vm554_vm0, 0.0, %v591_v3  ;;  %v1078_v20 = vmul.f32 %v1786_v31, %v2255_v61  ;;  %v2339_v61 = vld [vmem:[%s2563_s4] ss:$0 sm:$0xff] }
  0x8c   : > { %v702_v29 = vsel %vm663_vm1, %v700_v4, %v701_v37  ;;  %1413 = vst.msk [vmem:[%s1884_s14 + $0x90] sm:$0xff] %vm1394_vm2, %v1380_v34  ;;  %v1245_v23 = vadd.f32 %v1213_v12, %v1177_v7  ;;  %v810_v25 = vmul.f32 %v1756_v10, %v657_v19  ;;  %v878_v13 = vmul.f32 %v1758_v11, %v2302_v47 }
  0x8d   : > { %v1282_v24 = vmul.f32 %v1816_v52, %v2302_v47  ;;  %v977_v40 = vadd.f32 %v945_v27, %v909_v9  ;;  %v946_v15 = vmul.f32 %v1767_v17, %v702_v29  ;;  %v1110_v39 = vadd.f32 %v1078_v20, %v1042_v30 }
  0x8e   : > { %v1214_v28 = vmul.f32 %v1814_v51, %v657_v19  ;;  %v1313_v46 = vadd.f32 %v1281_v41, %v1245_v23  ;;  %v842_v33 = vadd.f32 %v2339_v61, %v810_v25  ;;  %v1012_v18 = vmul.f32 %v1776_v26, %v657_v19 }
  0x8f   : > { %v592_v16 = vrot.slane %v2314_v2, 7  ;;  %v1148_v50 = vmul.f32 %v1809_v48, %v702_v29  ;;  %v1178_v36 = vadd.f32 %v1146_v54, %v1110_v39  ;;  %v766_v14 = vsel %vm663_vm1, %v701_v37, 0.0  ;;  %v2354_v54 = vld [vmem:[%s1744_s27 + $0xc0] sm:$0xff] }
  0x90   : > { %v1043_v63 = vadd.f32 %v1011_v21, %v975_v35  ;;  %v1381_v6 = vadd.f32 %v1349_v38, %v1313_v46  ;;  %v910_v44 = vadd.f32 %v878_v13, %v842_v33  ;;  %v1350_v43 = vmul.f32 %v1820_v55, %v702_v29 }
  0x91   : > { %v593_v42 = vsel %vm554_vm0, %v591_v3, %v592_v16  ;;  %v1246_v1 = vadd.f32 %v1214_v28, %v1178_v36  ;;  %v879_v45 = vmul.f32 %v1758_v11, %v2314_v2  ;;  %v1079_v53 = vmul.f32 %v1786_v31, %v2267_v58  ;;  %v2366_v58 = vld [vmem:[%s1744_s27 + $0xc8] sm:$0xff] }
  0x92   : > { %v811_v59 = vmul.f32 %v1756_v10, %v593_v42  ;;  %1414 = vst.msk [vmem:[%s1884_s14 + $0x98] sm:$0xff] %vm1394_vm2, %v1381_v6  ;;  %v2358_v35 = vadd.f32 %v946_v15, %v910_v44  ;;  %v947_v56 = vmul.f32 %v1767_v17, %v766_v14  ;;  %v1013_v57 = vmul.f32 %v1776_v26, %v593_v42 }
  0x93   : > { %v1149_v5 = vmul.f32 %v1809_v48, %v766_v14  ;;  %v1314_v60 = vadd.f32 %v1282_v24, %v1246_v1  ;;  %v1111_v27 = vadd.f32 %v1079_v53, %v1043_v63  ;;  %v1215_v21 = vmul.f32 %v1814_v51, %v593_v42 }
  0x94   : > { %v843_v22 = vadd.f32 %v2339_v61, %v811_v59  ;;  %v1283_v62 = vmul.f32 %v1816_v52, %v2314_v2  ;;  %v594_v49 = vrot.slane %v2354_v54, 7  ;;  %v703_v0 = vrot.slane %v2354_v54, 1 }
  0x95   : > { %v704_v12 = vrot.slane %v2366_v58, 1  ;;  %v1382_v41 = vadd.f32 %v1350_v43, %v1314_v60  ;;  %v1179_v4 = vadd.f32 %v1147_v32, %v1111_v27  ;;  %v1044_v37 = vadd.f32 %v1012_v18, %v2306_v8 }
  0x96   : > { %v911_v3 = vadd.f32 %v879_v45, %v843_v22  ;;  %v1351_v34 = vmul.f32 %v1820_v55, %v766_v14  ;;  %v658_v9 = vsel %vm554_vm0, 0.0, %v594_v49  ;;  %v1080_v30 = vmul.f32 %v1786_v31, %v2302_v47 }
  0x97   : > { %v705_v7 = vsel %vm663_vm1, %v703_v0, %v704_v12  ;;  %1415 = vst.msk [vmem:[%s1884_s14 + $0xa0] sm:$0xff] %vm1394_vm2, %v1382_v41  ;;  %v1247_v38 = vadd.f32 %v1215_v21, %v1179_v4  ;;  %v812_v19 = vmul.f32 %v1756_v10, %v658_v9  ;;  %v880_v29 = vmul.f32 %v1758_v11, %v2354_v54 }
  0x98   : > { %v1284_v8 = vmul.f32 %v1816_v52, %v2354_v54  ;;  %v979_v32 = vadd.f32 %v947_v56, %v911_v3  ;;  %v948_v20 = vmul.f32 %v1767_v17, %v705_v7  ;;  %v1112_v23 = vadd.f32 %v1080_v30, %v1044_v37 }
  0x99   : > { %v1216_v25 = vmul.f32 %v1814_v51, %v658_v9  ;;  %v1315_v13 = vadd.f32 %v1283_v62, %v1247_v38  ;;  %v844_v47 = vadd.f32 %v2339_v61, %v812_v19  ;;  %v1014_v24 = vmul.f32 %v1776_v26, %v658_v9 }
  0x9a   : > { %v595_v15 = vrot.slane %v2366_v58, 7  ;;  %v1150_v39 = vmul.f32 %v1809_v48, %v705_v7  ;;  %v1180_v28 = vadd.f32 %v1148_v50, %v1112_v23  ;;  %v767_v46 = vsel %vm663_vm1, %v704_v12, 0.0  ;;  %v2401_v50 = vld [vmem:[%s1744_s27 + $0xd0] sm:$0xff] }
  0x9b   : > { %v1045_v33 = vadd.f32 %v1013_v57, %v977_v40  ;;  %v1383_v18 = vadd.f32 %v1351_v34, %v1315_v13  ;;  %v912_v16 = vadd.f32 %v880_v29, %v844_v47  ;;  %v1352_v36 = vmul.f32 %v1820_v55, %v705_v7 }
  0x9c   : > { %v596_v14 = vsel %vm554_vm0, %v594_v49, %v595_v15  ;;  %v1248_v63 = vadd.f32 %v1216_v25, %v1180_v28  ;;  %v881_v44 = vmul.f32 %v1758_v11, %v2366_v58  ;;  %v1081_v43 = vmul.f32 %v1786_v31, %v2314_v2  ;;  %v2413_v2 = vld [vmem:[%s1744_s27 + $0xd8] sm:$0xff] }
  0x9d   : > { %v813_v6 = vmul.f32 %v1756_v10, %v596_v14  ;;  %1416 = vst.msk [vmem:[%s1884_s14 + $0xa8] sm:$0xff] %vm1394_vm2, %v1383_v18  ;;  %v2405_v40 = vadd.f32 %v948_v20, %v912_v16  ;;  %v949_v42 = vmul.f32 %v1767_v17, %v767_v46  ;;  %v1015_v1 = vmul.f32 %v1776_v26, %v596_v14 }
  0x9e   : > { %v1151_v59 = vmul.f32 %v1809_v48, %v767_v46  ;;  %v1316_v45 = vadd.f32 %v1284_v8, %v1248_v63  ;;  %v1113_v56 = vadd.f32 %v1081_v43, %v1045_v33  ;;  %v1217_v57 = vmul.f32 %v1814_v51, %v596_v14 }
  0x9f   : > { %v845_v53 = vadd.f32 %v2339_v61, %v813_v6  ;;  %v1285_v60 = vmul.f32 %v1816_v52, %v2366_v58  ;;  %v597_v22 = vrot.slane %v2401_v50, 7  ;;  %v706_v27 = vrot.slane %v2401_v50, 1 }
  0xa0   : > { %v707_v21 = vrot.slane %v2413_v2, 1  ;;  %v1384_v62 = vadd.f32 %v1352_v36, %v1316_v45  ;;  %v1181_v0 = vadd.f32 %v1149_v5, %v1113_v56  ;;  %v1046_v12 = vadd.f32 %v1014_v24, %v2358_v35  ;;  %v2458_v45 = vld [vmem:[%s1744_s27 + $0xe8] sm:$0xff] }
  0xa1   : > { %v913_v49 = vadd.f32 %v881_v44, %v845_v53  ;;  %v1353_v41 = vmul.f32 %v1820_v55, %v767_v46  ;;  %v659_v3 = vsel %vm554_vm0, 0.0, %v597_v22  ;;  %v1082_v37 = vmul.f32 %v1786_v31, %v2354_v54 }
  0xa2   : > { %v708_v4 = vsel %vm663_vm1, %v706_v27, %v707_v21  ;;  %1417 = vst.msk [vmem:[%s1884_s14 + $0xb0] sm:$0xff] %vm1394_vm2, %v1384_v62  ;;  %v1249_v34 = vadd.f32 %v1217_v57, %v1181_v0  ;;  %v814_v9 = vmul.f32 %v1756_v10, %v659_v3  ;;  %v882_v7 = vmul.f32 %v1758_v11, %v2401_v50 }
  0xa3   : > { %v1286_v35 = vmul.f32 %v1816_v52, %v2401_v50  ;;  %v981_v5 = vadd.f32 %v949_v42, %v913_v49  ;;  %v950_v30 = vmul.f32 %v1767_v17, %v708_v4  ;;  %v1114_v38 = vadd.f32 %v1082_v37, %v1046_v12 }
  0xa4   : > { %v1218_v19 = vmul.f32 %v1814_v51, %v659_v3  ;;  %v1317_v29 = vadd.f32 %v1285_v60, %v1249_v34  ;;  %v846_v54 = vadd.f32 %v2339_v61, %v814_v9  ;;  %v1016_v8 = vmul.f32 %v1776_v26, %v659_v3 }
  0xa5   : > { %v598_v20 = vrot.slane %v2413_v2, 7  ;;  %v1152_v23 = vmul.f32 %v1809_v48, %v708_v4  ;;  %v1182_v25 = vadd.f32 %v1150_v39, %v1114_v38  ;;  %v768_v13 = vsel %vm663_vm1, %v707_v21, 0.0  ;;  %v2448_v39 = vld [vmem:[%s1744_s27 + $0xe0] sm:$0xff] }
  0xa6   : > { %v1047_v47 = vadd.f32 %v1015_v1, %v979_v32  ;;  %v1385_v24 = vadd.f32 %v1353_v41, %v1317_v29  ;;  %v914_v15 = vadd.f32 %v882_v7, %v846_v54  ;;  %v1354_v28 = vmul.f32 %v1820_v55, %v708_v4 }
  0xa7   : > { %v599_v46 = vsel %vm554_vm0, %v597_v22, %v598_v20  ;;  %v1250_v33 = vadd.f32 %v1218_v19, %v1182_v25  ;;  %v883_v16 = vmul.f32 %v1758_v11, %v2413_v2  ;;  %v1083_v36 = vmul.f32 %v1786_v31, %v2366_v58 }
  0xa8   : > { %v815_v18 = vmul.f32 %v1756_v10, %v599_v46  ;;  %1418 = vst.msk [vmem:[%s1884_s14 + $0xb8] sm:$0xff] %vm1394_vm2, %v1385_v24  ;;  %v982_v32 = vadd.f32 %v950_v30, %v914_v15  ;;  %v951_v14 = vmul.f32 %v1767_v17, %v768_v13  ;;  %v1017_v63 = vmul.f32 %v1776_v26, %v599_v46 }
  0xa9   : > { %v1153_v6 = vmul.f32 %v1809_v48, %v768_v13  ;;  %v1318_v44 = vadd.f32 %v1286_v35, %v1250_v33  ;;  %v1115_v42 = vadd.f32 %v1083_v36, %v1047_v47  ;;  %v1219_v1 = vmul.f32 %v1814_v51, %v599_v46 }
  0xaa   : > { %v847_v43 = vadd.f32 %v2339_v61, %v815_v18  ;;  %v1287_v58 = vmul.f32 %v1816_v52, %v2413_v2  ;;  %v600_v53 = vrot.slane %v2448_v39, 7  ;;  %v709_v56 = vrot.slane %v2448_v39, 1 }
  0xab   : > { %v710_v57 = vrot.slane %v2458_v45, 1  ;;  %v1386_v60 = vadd.f32 %v1354_v28, %v1318_v44  ;;  %v1183_v27 = vadd.f32 %v1151_v59, %v1115_v42  ;;  %v1048_v21 = vadd.f32 %v1016_v8, %v2405_v40  ;;  %v516_v28 = vld [vmem:[%s1744_s27 + $0xf0] sm:$0xff] }
  0xac   : > { %v915_v22 = vadd.f32 %v883_v16, %v847_v43  ;;  %v1355_v62 = vmul.f32 %v1820_v55, %v768_v13  ;;  %v660_v49 = vsel %vm554_vm0, 0.0, %v600_v53  ;;  %v1084_v12 = vmul.f32 %v1786_v31, %v2401_v50 }
  0xad   : > { %v711_v0 = vsel %vm663_vm1, %v709_v56, %v710_v57  ;;  %1419 = vst.msk [vmem:[%s1884_s14 + $0xc0] sm:$0xff] %vm1394_vm2, %v1386_v60  ;;  %v1251_v41 = vadd.f32 %v1219_v1, %v1183_v27  ;;  %v816_v3 = vmul.f32 %v1756_v10, %v660_v49  ;;  %v884_v4 = vmul.f32 %v1758_v11, %v2448_v39 }
  0xae   : > { %v1288_v40 = vmul.f32 %v1816_v52, %v2448_v39  ;;  %v983_v59 = vadd.f32 %v951_v14, %v915_v22  ;;  %v952_v37 = vmul.f32 %v1767_v17, %v711_v0  ;;  %v1116_v34 = vadd.f32 %v1084_v12, %v1048_v21  ;;  %v517_v14 = vld [vmem:[%s1744_s27 + $0xf8] sm:$0xff] }
  0xaf   : > { %v1220_v9 = vmul.f32 %v1814_v51, %v660_v49  ;;  %v1319_v7 = vadd.f32 %v1287_v58, %v1251_v41  ;;  %v848_v50 = vadd.f32 %v2339_v61, %v816_v3  ;;  %v1018_v35 = vmul.f32 %v1776_v26, %v660_v49  ;;  %v481_v3 = vld [vmem:[%s446_s23] sm:$0xff] }
  0xb0   : > { %v601_v30 = vrot.slane %v2458_v45, 7  ;;  %v1154_v38 = vmul.f32 %v1809_v48, %v711_v0  ;;  %v1184_v19 = vadd.f32 %v1152_v23, %v1116_v34  ;;  %v769_v29 = vsel %vm663_vm1, %v710_v57, 0.0 }
  0xb1   : > { %v1049_v54 = vadd.f32 %v1017_v63, %v981_v5  ;;  %v1387_v8 = vadd.f32 %v1355_v62, %v1319_v7  ;;  %v916_v20 = vadd.f32 %v884_v4, %v848_v50  ;;  %v1356_v25 = vmul.f32 %v1820_v55, %v711_v0  ;;  %v482_v4 = vld [vmem:[%s446_s23 + $0x8] sm:$0xff] }
  0xb2   : > { %v602_v13 = vsel %vm554_vm0, %v600_v53, %v601_v30  ;;  %v1252_v47 = vadd.f32 %v1220_v9, %v1184_v19  ;;  %v885_v15 = vmul.f32 %v1758_v11, %v2458_v45  ;;  %v1085_v23 = vmul.f32 %v1786_v31, %v2413_v2 }
  0xb3   : > { %v817_v24 = vmul.f32 %v1756_v10, %v602_v13  ;;  %1420 = vst.msk [vmem:[%s1884_s14 + $0xc8] sm:$0xff] %vm1394_vm2, %v1387_v8  ;;  %v984_v5 = vadd.f32 %v952_v37, %v916_v20  ;;  %v953_v46 = vmul.f32 %v1767_v17, %v769_v29  ;;  %v1019_v33 = vmul.f32 %v1776_v26, %v602_v13 }
  0xb4   : > { %v1221_v18 = vmul.f32 %v1814_v51, %v602_v13  ;;  %v1320_v16 = vadd.f32 %v1288_v40, %v1252_v47  ;;  %v1117_v10 = vadd.f32 %v1085_v23, %v1049_v54  ;;  %v1289_v11 = vmul.f32 %v1816_v52, %v2458_v45 }
  0xb5   : > { %v849_v36 = vadd.f32 %v2339_v61, %v817_v24  ;;  %v603_v2 = vrot.slane %v516_v28, 7  ;;  %v712_v63 = vrot.slane %v516_v28, 1  ;;  %v713_v44 = vrot.slane %v517_v14, 1 }
  0xb6   : > { %v1050_v43 = vadd.f32 %v1018_v35, %v982_v32  ;;  %v1388_v42 = vadd.f32 %v1356_v25, %v1320_v16  ;;  %v1185_v1 = vadd.f32 %v1153_v6, %v1117_v10  ;;  %v1086_v58 = vmul.f32 %v1786_v31, %v2448_v39 }
  0xb7   : > { %v917_v17 = vadd.f32 %v885_v15, %v849_v36  ;;  %v1155_v53 = vmul.f32 %v1809_v48, %v769_v29  ;;  %v661_v61 = vsel %vm554_vm0, 0.0, %v603_v2  ;;  %v714_v56 = vsel %vm663_vm1, %v712_v63, %v713_v44 }
  0xb8   : > { %v604_v57 = vrot.slane %v517_v14, 7  ;;  %1421 = vst.msk [vmem:[%s1884_s14 + $0xd0] sm:$0xff] %vm1394_vm2, %v1388_v42  ;;  %v1253_v32 = vadd.f32 %v1221_v18, %v1185_v1  ;;  %v1357_v60 = vmul.f32 %v1820_v55, %v769_v29  ;;  %v1118_v6 = vadd.f32 %v1086_v58, %v1050_v43 }
  0xb9   : > { %v1290_v22 = vmul.f32 %v1816_v52, %v516_v28  ;;  %v985_v39 = vadd.f32 %v953_v46, %v917_v17  ;;  %v1020_v27 = vmul.f32 %v1776_v26, %v661_v61  ;;  %v1222_v21 = vmul.f32 %v1814_v51, %v661_v61 }
  0xba   : > { %v605_v62 = vsel %vm554_vm0, %v603_v2, %v604_v57  ;;  %v1321_v49 = vadd.f32 %v1289_v11, %v1253_v32  ;;  %v1156_v0 = vmul.f32 %v1809_v48, %v714_v56  ;;  %v1186_v12 = vadd.f32 %v1154_v38, %v1118_v6 }
  0xbb   : > { %v1021_v41 = vmul.f32 %v1776_v26, %v605_v62  ;;  %v1358_v40 = vmul.f32 %v1820_v55, %v714_v56  ;;  %v770_v37 = vsel %vm663_vm1, %v713_v44, 0.0  ;;  %v1051_v34 = vadd.f32 %v1019_v33, %v983_v59 }
  0xbc   : > { %v1087_v9 = vmul.f32 %v1786_v31, %v2458_v45  ;;  %v1389_v7 = vadd.f32 %v1357_v60, %v1321_v49  ;;  %v1254_v50 = vadd.f32 %v1222_v21, %v1186_v12  ;;  %v1223_v35 = vmul.f32 %v1814_v51, %v605_v62 }
  0xbd   : > { %v1291_v30 = vmul.f32 %v1816_v52, %v517_v14  ;;  %v484_v19 = vmul.f32 0.0, %v481_v3  ;;  %v485_v29 = vmul.f32 0.0, %v482_v4  ;;  %v1052_v26 = vadd.f32 %v1020_v27, %v984_v5 }
  0xbe   : > { %v1119_v38 = vadd.f32 %v1087_v9, %v1051_v34  ;;  %1422 = vst.msk [vmem:[%s1884_s14 + $0xd8] sm:$0xff] %vm1394_vm2, %v1389_v7  ;;  %v1322_v54 = vadd.f32 %v1290_v22, %v1254_v50  ;;  %v1088_v8 = vmul.f32 %v1786_v31, %v516_v28  ;;  %v1053_v59 = vadd.f32 %v1021_v41, %v985_v39 }
  0xbf   : > { %v1089_v20 = vmul.f32 %v1786_v31, %v517_v14  ;;  %v606_v25 = vrot.slane %v484_v19, 7  ;;  %v715_v13 = vrot.slane %v484_v19, 1  ;;  %v716_v47 = vrot.slane %v485_v29, 1 }
  0xc0   : > { %v1187_v45 = vadd.f32 %v1155_v53, %v1119_v38  ;;  %v1390_v24 = vadd.f32 %v1358_v40, %v1322_v54  ;;  %v1157_v15 = vmul.f32 %v1809_v48, %v770_v37  ;;  %v1120_v23 = vadd.f32 %v1088_v8, %v1052_v26 }
  0xc1   : > { %v607_v46 = vrot.slane %v485_v29, 7  ;;  %v1359_v5 = vmul.f32 %v1820_v55, %v770_v37  ;;  %v662_v18 = vsel %vm554_vm0, 0.0, %v606_v25  ;;  %v717_v16 = vsel %vm663_vm1, %v715_v13, %v716_v47 }
  0xc2   : > { %v1255_v33 = vadd.f32 %v1223_v35, %v1187_v45  ;;  %1423 = vst.msk [vmem:[%s1884_s14 + $0xe0] sm:$0xff] %vm1394_vm2, %v1390_v24  ;;  %v1188_v31 = vadd.f32 %v1156_v0, %v1120_v23  ;;  %v1224_v28 = vmul.f32 %v1814_v51, %v662_v18  ;;  %v1292_v36 = vmul.f32 %v1816_v52, %v484_v19 }
  0xc3   : > { %v608_v10 = vsel %vm554_vm0, %v606_v25, %v607_v46  ;;  %v1121_v11 = vadd.f32 %v1089_v20, %v1053_v59  ;;  %v1360_v63 = vmul.f32 %v1820_v55, %v717_v16  ;;  %v771_v44 = vsel %vm663_vm1, %v716_v47, 0.0 }
  0xc4   : > { %v1323_v48 = vadd.f32 %v1291_v30, %v1255_v33  ;;  %v1225_v14 = vmul.f32 %v1814_v51, %v608_v10  ;;  %v1256_v2 = vadd.f32 %v1224_v28, %v1188_v31  ;;  %v1293_v17 = vmul.f32 %v1816_v52, %v485_v29 }
  0xc5   : > { %v1189_v42 = vadd.f32 %v1157_v15, %v1121_v11  ;;  %v1361_v53 = vmul.f32 %v1820_v55, %v771_v44 }
  0xc6   : > { %v1391_v43 = vadd.f32 %v1359_v5, %v1323_v48  ;;  %v1324_v1 = vadd.f32 %v1292_v36, %v1256_v2 }
  0xc7   : > { %v1257_v58 = vadd.f32 %v1225_v14, %v1189_v42 }
  0xc8   : > { %1424 = vst.msk [vmem:[%s1884_s14 + $0xe8] sm:$0xff] %vm1394_vm2, %v1391_v43  ;;  %v1392_v61 = vadd.f32 %v1360_v63, %v1324_v1 }
  0xc9   : > { %v1325_v56 = vadd.f32 %v1293_v17, %v1257_v58 }
  0xca   : > { %1425 = vst.msk [vmem:[%s1884_s14 + $0xf0] sm:$0xff] %vm1394_vm2, %v1392_v61 }
  0xcb   : > { %v1393_v51 = vadd.f32 %v1361_v53, %v1325_v56 }
  0xcd   : > { %1426 = vst.msk [vmem:[%s1884_s14 + $0xf8] sm:$0xff] %vm1394_vm2, %v1393_v51 }
  0xce PF: > { %s15_s20 = sadd.s32 1, %s1685_s20   ;;  %s2565_s18 = smov %s1681_s19 }
  0xcf   : > { %p12_p5 = scmp.ge.s32.totalorder %s15_s20, 4   ;;  %s2566_s19 = smov %s2568_s21 }
  0xd1   :  { %14 = sbr.rel (!%p12_p5) target bundleno = 2 (0x2), region = 82 }

</bundles_post_ra>
